<compile_context>
chip_gen: v5e
topology: v5e:2x2
jax: 0.10.0
libtpu: 0.0.40
codegen_flags: <defaults>
</compile_context>

<pallas_src>
import numpy as np
import jax
import jax.numpy as jnp
from jax.experimental import pallas as pl
from jax.experimental.pallas import tpu as pltpu


# ----------------------------------------------------------------------------
# Parameter construction (mirrors ImprovedMPS.__init__; init-time only — the QR
# orthogonalization / canonical sweep is host-side, not part of the forward).
# ----------------------------------------------------------------------------
def compute_optimal_bond_dims(num_sites, phys_dim, bond_dim):
    bond_dims = [1]
    for i in range(num_sites):
        if i < num_sites // 2:
            nb = min(bond_dim, bond_dims[-1] * phys_dim)
        else:
            mirror = num_sites - 1 - i
            if mirror < len(bond_dims):
                nb = bond_dims[mirror]
            else:
                nb = max(1, bond_dims[-1] // phys_dim)
        bond_dims.append(max(1, min(nb, bond_dim)))
    bond_dims[-1] = 1
    return bond_dims


def orthogonalize(t):
    L, P, R = t.shape
    m = t.reshape(L * P, R)
    if m.shape[0] >= m.shape[1]:
        q, _ = np.linalg.qr(m)
        return q.reshape(L, P, -1)
    q, _ = np.linalg.qr(m.T)
    return q.T.reshape(L, P, -1)


def init_mps_params(num_sites, phys_dim, bond_dim, num_classes, key):
    bond_dims = compute_optimal_bond_dims(num_sites, phys_dim, bond_dim)
    keys = jax.random.split(key, num_sites + 2)
    tensors = []
    for i in range(num_sites):
        L, R = bond_dims[i], bond_dims[i + 1]
        std = np.sqrt(2.0 / (L * phys_dim + phys_dim * R))
        t = np.asarray(jax.random.normal(keys[i], (L, phys_dim, R), jnp.float32)) * std
        if 0 < i < num_sites - 1:
            t = orthogonalize(t)
        tensors.append(np.asarray(t, np.float32))
    # left-canonical sweep (mirrors _canonical_form)
    for i in range(num_sites - 1):
        L, P, R = tensors[i].shape
        q, r = np.linalg.qr(tensors[i].reshape(L * P, R))
        tensors[i] = q.reshape(L, P, -1).astype(np.float32)
        nL, nP, nR = tensors[i + 1].shape
        tensors[i + 1] = (r @ tensors[i + 1].reshape(nL, nP * nR)).reshape(
            r.shape[0], nP, nR).astype(np.float32)
    final_bond = tensors[-1].shape[2]  # == 1
    bound = 1.0 / np.sqrt(final_bond)
    W = np.asarray(jax.random.uniform(keys[num_sites], (num_classes, final_bond),
                                      jnp.float32, -bound, bound))
    b = np.asarray(jax.random.uniform(keys[num_sites + 1], (num_classes,),
                                      jnp.float32, -bound, bound))
    return tensors, W, b


# ----------------------------------------------------------------------------
# Pallas kernel: MPS bond recurrence + classifier, batch on lanes.
# ----------------------------------------------------------------------------
def mps_kernel(x_ref, a_ref, w_ref, o_ref, left_ref):
    # x_ref: (TS, P, TB) streamed features          a_ref: (TS, D, P*D) packed cores
    # w_ref: (Cp, D+8) f32 classifier (bias in col D)
    # o_ref: (Cp, TB) f32 logits                    left_ref: VMEM (D, TB) f32 carried bond vec
    si = pl.program_id(1)
    TS, P, TB = x_ref.shape
    D = left_ref.shape[0]

    @pl.when(si == 0)
    def _init():
        # True left boundary bond dim is 1 -> left = e_0 for every batch lane.
        left_ref[...] = jnp.where(
            jax.lax.broadcasted_iota(jnp.int32, (D, TB), 0) == 0,
            jnp.float32(1.0), jnp.float32(0.0))

    def site_step(i, left):
        x_i = x_ref[i]                      # (P, TB)   leading-index view
        m_i = a_ref[i]                      # (D, P*D), m_i[d, p*D + l] = A[l, p, d]
        # outer[p*D+l, b] = x[p,b] * left[l,b]; reshape collapses along full (8,128) tiles.
        outer = (x_i.astype(jnp.float32)[:, None, :] * left[None, :, :]).reshape(P * D, TB)
        # One single-pass MXU matmul per site (stream-dtype operands, f32 accumulation).
        # No Precision.HIGHEST here: the site dots are a strictly serial chain.
        return jnp.dot(m_i, outer.astype(m_i.dtype),
                       preferred_element_type=jnp.float32)

    # Partial unroll keeps the next site's load/broadcast overlapping the pending
    # MXU pop without blowing up code size for large site tiles.
    left_ref[...] = jax.lax.fori_loop(0, TS, site_step, left_ref[...],
                                      unroll=min(8, TS))

    @pl.when(si == pl.num_programs(1) - 1)
    def _finalize():
        # Bias folded in: append constant-1 rows to left; bias lives in w_ref[:, D].
        left_aug = jnp.concatenate(
            [left_ref[...], jnp.ones((8, TB), jnp.float32)], axis=0)     # (D+8, TB)
        logits = jnp.dot(w_ref[...], left_aug,
                         preferred_element_type=jnp.float32,
                         precision=jax.lax.Precision.HIGHEST)            # one-shot, cheap
        o_ref[...] = logits.astype(o_ref.dtype)                          # lane-dense store


# ----------------------------------------------------------------------------
# Wrapper: packing / padding / pallas_call
# ----------------------------------------------------------------------------
def _round_up(n, m):
    return (n + m - 1) // m * m


def pack_mps_params(tensors, W, b, D, C_pad, Sp, stream_dtype):
    """Pack per-site cores into the MXU-ready slab M[i][d, p*D + l] = A_i[l, p, d]."""
    S = len(tensors)
    P = tensors[0].shape[1]
    A = np.zeros((Sp, D, P * D), np.float32)
    for i, t in enumerate(tensors):
        L, _, R = t.shape
        tmp = np.zeros((D, P, D), np.float32)
        tmp[:R, :, :L] = np.transpose(t, (2, 1, 0))          # (R, P, L)
        A[i] = tmp.reshape(D, P * D)
    # Identity pad sites: M[d, 0*D + l] = delta(d,l), with x_pad = e_0 -> left_new = left.
    for i in range(S, Sp):
        A[i, :, :D] = np.eye(D, dtype=np.float32)
    # Classifier with bias folded in (final bond dim == 1 -> real W sits in column 0).
    W_aug = np.zeros((C_pad, D + 8), np.float32)
    W_aug[:W.shape[0], :W.shape[1]] = W
    W_aug[:b.shape[0], D] = b
    return jnp.asarray(A, dtype=stream_dtype), jnp.asarray(W_aug)


def _prepare_inputs(x, tensors, W, b, batch_tile, site_tile, stream_dtype):
    B, S, P = x.shape
    C = W.shape[0]
    D = max(max(t.shape[0], t.shape[2]) for t in tensors)
    D = _round_up(D, 8)                # sublane-friendly padded bond dim
    C_pad = _round_up(C, 8)            # sublane-friendly padded class dim

    if batch_tile is None:
        # 256 lanes fills the v6e/v7x 256-wide MXU per pass; keep 128 for small
        # batches so v7x (2 TCs) still gets >= 2 'parallel' batch tiles.
        batch_tile = 256 if B >= 512 else 128

    ts = min(site_tile, S)
    Sp = _round_up(S, ts)              # pad chain with identity sites
    Bp = _round_up(B, batch_tile)      # lane-dense batch

    A, W_aug = pack_mps_params(tensors, W, b, D, C_pad, Sp, stream_dtype)

    # Single fused pad-of-transpose (no zeros().at[].set() double materialization).
    x_t = jnp.pad(jnp.transpose(x.astype(stream_dtype), (1, 2, 0)),
                  ((0, 0), (0, 0), (0, Bp - B)))                       # (S, P, Bp)
    if Sp > S:
        pad_sites = jnp.zeros((Sp - S, P, Bp), stream_dtype).at[:, 0, :].set(1)
        x_t = jnp.concatenate([x_t, pad_sites], axis=0)                # (Sp, P, Bp)

    dims = dict(B=B, S=S, P=P, C=C, D=D, C_pad=C_pad,
                batch_tile=batch_tile, ts=ts, Sp=Sp, Bp=Bp)
    return x_t, A, W_aug, dims


def mps_forward_pallas(x, tensors, W, b, *, batch_tile=None, site_tile=64,
                       stream_dtype=jnp.bfloat16):
    xp, A, W_aug, d = _prepare_inputs(x, tensors, W, b, batch_tile, site_tile,
                                      stream_dtype)
    P, D, C_pad = d["P"], d["D"], d["C_pad"]
    bt, ts = d["batch_tile"], d["ts"]
    nb, ns = d["Bp"] // bt, d["Sp"] // ts
    DP = P * D

    # TODO(synk): when bond_dim scales up, keep the A slab VMEM-resident (full-Sp
    #   block, constant index_map) and raise vmem_limit_bytes; on v7x (64 MiB
    #   physical VMEM) cap the resident size or keep streaming.
    # TODO(synk): v5e/v6e MRF-latency hiding: interleave 2 independent batch
    #   sub-chains per grid step (left scratch (2, D, bt), alternate the dots).
    out = pl.pallas_call(
        mps_kernel,
        out_shape=jax.ShapeDtypeStruct((C_pad, d["Bp"]), jnp.float32),
        grid_spec=pltpu.PrefetchScalarGridSpec(
            num_scalar_prefetch=0,
            grid=(nb, ns),                       # (batch tiles: parallel, site chunks: arbitrary)
            in_specs=[
                pl.BlockSpec((ts, P, bt),     lambda bi, si: (si, 0, bi)),   # x (streamed)
                pl.BlockSpec((ts, D, DP),     lambda bi, si: (si, 0, 0)),    # cores (streamed)
                pl.BlockSpec((C_pad, D + 8),  lambda bi, si: (0, 0)),        # classifier + bias
            ],
            out_specs=pl.BlockSpec((C_pad, bt), lambda bi, si: (0, bi)),
            scratch_shapes=[pltpu.VMEM((D, bt), jnp.float32)],               # carried `left`
        ),
        compiler_params=pltpu.CompilerParams(
            dimension_semantics=("parallel", "arbitrary")),
    )(xp, A, W_aug)
    return out[:d["C"], :d["B"]].T               # back to (batch, num_classes)


# ----------------------------------------------------------------------------
# References
# ----------------------------------------------------------------------------
def mps_forward_xla(x, tensors, W, b, *, batch_tile=None, site_tile=64,
                    stream_dtype=jnp.bfloat16):
    """Plain-XLA twin of the kernel (same packing / dtypes / accumulation) — used
    as a tight parity check on the Pallas plumbing (BlockSpecs, grid, scratch carry)."""
    xp, A, W_aug, d = _prepare_inputs(x, tensors, W, b, batch_tile, site_tile,
                                      stream_dtype)
    P, D, Bp, Sp = d["P"], d["D"], d["Bp"], d["Sp"]
    left = jnp.zeros((D, Bp), jnp.float32).at[0, :].set(1.0)
    for i in range(Sp):
        outer = (xp[i].astype(jnp.float32)[:, None, :] * left[None, :, :]).reshape(P * D, Bp)
        left = jnp.dot(A[i], outer.astype(A.dtype), preferred_element_type=jnp.float32)
    left_aug = jnp.concatenate([left, jnp.ones((8, Bp), jnp.float32)], axis=0)
    logits = jnp.dot(W_aug, left_aug, preferred_element_type=jnp.float32,
                     precision=jax.lax.Precision.HIGHEST)
    return logits[:d["C"], :d["B"]].T


def mps_forward_ref(x, tensors, W, b):
    """Exact float64 reference (mirrors ImprovedMPS.forward)."""
    xb = np.asarray(x, np.float64)
    left = np.ones((xb.shape[0], 1), np.float64)
    for i, t in enumerate(tensors):
        contracted = np.einsum('bp,lpd->bld', xb[:, i, :], np.asarray(t, np.float64))
        left = np.einsum('bl,bld->bd', left, contracted)
    return left @ np.asarray(W, np.float64).T + np.asarray(b, np.float64)


if __name__ == "__main__":
    num_sites, phys_dim, bond_dim, num_classes = 8, 4, 8, 10
    batch = 2

    key = jax.random.PRNGKey(0)
    k_param, k_x = jax.random.split(key)

    tensors, W, b = init_mps_params(num_sites, phys_dim, bond_dim, num_classes, k_param)
    x = jax.random.uniform(k_x, (batch, num_sites, phys_dim), jnp.float32)

    fwd = jax.jit(lambda xx: mps_forward_pallas(xx, tensors, W, b))
    out = jax.block_until_ready(fwd(x))
    out_np = np.asarray(out, np.float64)

    # 1) Parity vs an XLA twin with identical packing / bf16 streaming / f32 accumulation
    #    (checks the Pallas plumbing; tolerance leaves room for pass-order/rounding diffs).
    twin = np.asarray(mps_forward_xla(x, tensors, W, b), np.float64)
    np.testing.assert_allclose(out_np, twin, rtol=5e-2, atol=5e-2)

    # 2) Sanity vs the exact float64 reference.  The kernel streams A/x as bf16 with
    #    single-pass MXU matmuls (per perf review), so tolerances are relaxed vs fp32.
    ref = mps_forward_ref(np.asarray(x), tensors, W, b)
    np.testing.assert_allclose(out_np, ref, rtol=1e-1, atol=2.5e-1)

    print("KERNEL_OK")
</pallas_src>

<mosaic_0001>
module attributes {stable_mosaic.version = 11 : i64} {
  func.func @mps_kernel(%arg0: i32, %arg1: i32, %arg2: memref<8x4x128xbf16, #tpu.memory_space<vmem>>, %arg3: memref<8x8x32xbf16, #tpu.memory_space<vmem>>, %arg4: memref<16x16xf32, #tpu.memory_space<vmem>>, %arg5: memref<16x128xf32, #tpu.memory_space<vmem>>, %arg6: memref<8x128xf32, #tpu.memory_space<vmem>>) attributes {dimension_semantics = [#tpu.dimension_semantics<parallel>, #tpu.dimension_semantics<arbitrary>], iteration_bounds = array<i64: 1, 1>, scalar_prefetch = 0 : i64, scratch_operands = 1 : i64, tpu.core_type = #tpu.core_type<tc>, window_params = [{transform_indices = @transform_0, window_bounds = array<i64: 8, 4, 128>}, {transform_indices = @transform_1, window_bounds = array<i64: 8, 8, 32>}, {pipeline_mode = #tpu.pipeline_mode<synchronous>, transform_indices = @transform_2, window_bounds = array<i64: 16, 16>}, {transform_indices = @transform_3, window_bounds = array<i64: 16, 128>}]} {
    %c0_i32 = arith.constant 0 : i32
    %0 = arith.cmpi eq, %arg1, %c0_i32 : i32
    %1 = arith.extui %0 : i1 to i32
    %c0_i32_0 = arith.constant 0 : i32
    %2 = arith.cmpi ne, %1, %c0_i32_0 : i32
    scf.if %2 {
      %128 = tpu.iota {dimensions = array<i32: 0>} : vector<8x128xi32>
      %c0_i32_46 = arith.constant 0 : i32
      %129 = vector.broadcast %c0_i32_46 : i32 to vector<8x128xi32>
      %130 = arith.cmpi eq, %128, %129 : vector<8x128xi32>
      %cst_47 = arith.constant 1.000000e+00 : f32
      %cst_48 = arith.constant 0.000000e+00 : f32
      %131 = vector.broadcast %cst_47 : f32 to vector<8x128xf32>
      %132 = vector.broadcast %cst_48 : f32 to vector<8x128xf32>
      %133 = arith.select %130, %131, %132 : vector<8x128xi1>, vector<8x128xf32>
      %c0_49 = arith.constant 0 : index
      %c0_50 = arith.constant 0 : index
      %134 = vector.load %arg6[%c0_49, %c0_50] : memref<8x128xf32, #tpu.memory_space<vmem>>, vector<8x128xf32>
      tpu.vector_store %arg6[%c0_49, %c0_50], %133 {strides = array<i32>} : memref<8x128xf32, #tpu.memory_space<vmem>>, vector<8x128xf32>,
    } else {
    }
    %c0 = arith.constant 0 : index
    %c0_1 = arith.constant 0 : index
    %3 = vector.load %arg6[%c0, %c0_1] : memref<8x128xf32, #tpu.memory_space<vmem>>, vector<8x128xf32>
    %c0_i32_2 = arith.constant 0 : i32
    %4 = arith.index_cast %c0_i32_2 : i32 to index
    %c0_3 = arith.constant 0 : index
    %c0_4 = arith.constant 0 : index
    %5 = vector.load %arg2[%4, %c0_3, %c0_4] : memref<8x4x128xbf16, #tpu.memory_space<vmem>>, vector<1x4x128xbf16>
    %6 = vector.shape_cast %5 : vector<1x4x128xbf16> to vector<4x128xbf16>
    %7 = arith.index_cast %c0_i32_2 : i32 to index
    %c0_5 = arith.constant 0 : index
    %c0_6 = arith.constant 0 : index
    %8 = vector.load %arg3[%7, %c0_5, %c0_6] : memref<8x8x32xbf16, #tpu.memory_space<vmem>>, vector<1x8x32xbf16>
    %9 = vector.shape_cast %8 : vector<1x8x32xbf16> to vector<8x32xbf16>
    %10 = arith.extf %6 : vector<4x128xbf16> to vector<4x128xf32>
    %11 = vector.shape_cast %10 : vector<4x128xf32> to vector<4x1x128xf32>
    %12 = vector.shape_cast %3 : vector<8x128xf32> to vector<1x8x128xf32>
    %13 = vector.broadcast %11 : vector<4x1x128xf32> to vector<4x8x128xf32>
    %14 = vector.broadcast %12 : vector<1x8x128xf32> to vector<4x8x128xf32>
    %15 = arith.mulf %13, %14 : vector<4x8x128xf32>
    %16 = vector.shape_cast %15 : vector<4x8x128xf32> to vector<32x128xf32>
    %17 = arith.truncf %16 : vector<32x128xf32> to vector<32x128xbf16>
    %cst = arith.constant dense<0.000000e+00> : vector<8x128xf32>
    %18 = tpu.matmul %9, %17, %cst {dimension_numbers = #tpu.dot_dimension_numbers<[1], [0], [0], [1], [0, 0, 1, 1], [], []>} : vector<8x32xbf16>, vector<32x128xbf16>, vector<8x128xf32> -> vector<8x128xf32>
    %c1_i32 = arith.constant 1 : i32
    %19 = arith.index_cast %c1_i32 : i32 to index
    %c0_7 = arith.constant 0 : index
    %c0_8 = arith.constant 0 : index
    %20 = vector.load %arg2[%19, %c0_7, %c0_8] : memref<8x4x128xbf16, #tpu.memory_space<vmem>>, vector<1x4x128xbf16>
    %21 = vector.shape_cast %20 : vector<1x4x128xbf16> to vector<4x128xbf16>
    %22 = arith.index_cast %c1_i32 : i32 to index
    %c0_9 = arith.constant 0 : index
    %c0_10 = arith.constant 0 : index
    %23 = vector.load %arg3[%22, %c0_9, %c0_10] : memref<8x8x32xbf16, #tpu.memory_space<vmem>>, vector<1x8x32xbf16>
    %24 = vector.shape_cast %23 : vector<1x8x32xbf16> to vector<8x32xbf16>
    %25 = arith.extf %21 : vector<4x128xbf16> to vector<4x128xf32>
    %26 = vector.shape_cast %25 : vector<4x128xf32> to vector<4x1x128xf32>
    %27 = vector.shape_cast %18 : vector<8x128xf32> to vector<1x8x128xf32>
    %28 = vector.broadcast %26 : vector<4x1x128xf32> to vector<4x8x128xf32>
    %29 = vector.broadcast %27 : vector<1x8x128xf32> to vector<4x8x128xf32>
    %30 = arith.mulf %28, %29 : vector<4x8x128xf32>
    %31 = vector.shape_cast %30 : vector<4x8x128xf32> to vector<32x128xf32>
    %32 = arith.truncf %31 : vector<32x128xf32> to vector<32x128xbf16>
    %cst_11 = arith.constant dense<0.000000e+00> : vector<8x128xf32>
    %33 = tpu.matmul %24, %32, %cst_11 {dimension_numbers = #tpu.dot_dimension_numbers<[1], [0], [0], [1], [0, 0, 1, 1], [], []>} : vector<8x32xbf16>, vector<32x128xbf16>, vector<8x128xf32> -> vector<8x128xf32>
    %c2_i32 = arith.constant 2 : i32
    %34 = arith.index_cast %c2_i32 : i32 to index
    %c0_12 = arith.constant 0 : index
    %c0_13 = arith.constant 0 : index
    %35 = vector.load %arg2[%34, %c0_12, %c0_13] : memref<8x4x128xbf16, #tpu.memory_space<vmem>>, vector<1x4x128xbf16>
    %36 = vector.shape_cast %35 : vector<1x4x128xbf16> to vector<4x128xbf16>
    %37 = arith.index_cast %c2_i32 : i32 to index
    %c0_14 = arith.constant 0 : index
    %c0_15 = arith.constant 0 : index
    %38 = vector.load %arg3[%37, %c0_14, %c0_15] : memref<8x8x32xbf16, #tpu.memory_space<vmem>>, vector<1x8x32xbf16>
    %39 = vector.shape_cast %38 : vector<1x8x32xbf16> to vector<8x32xbf16>
    %40 = arith.extf %36 : vector<4x128xbf16> to vector<4x128xf32>
    %41 = vector.shape_cast %40 : vector<4x128xf32> to vector<4x1x128xf32>
    %42 = vector.shape_cast %33 : vector<8x128xf32> to vector<1x8x128xf32>
    %43 = vector.broadcast %41 : vector<4x1x128xf32> to vector<4x8x128xf32>
    %44 = vector.broadcast %42 : vector<1x8x128xf32> to vector<4x8x128xf32>
    %45 = arith.mulf %43, %44 : vector<4x8x128xf32>
    %46 = vector.shape_cast %45 : vector<4x8x128xf32> to vector<32x128xf32>
    %47 = arith.truncf %46 : vector<32x128xf32> to vector<32x128xbf16>
    %cst_16 = arith.constant dense<0.000000e+00> : vector<8x128xf32>
    %48 = tpu.matmul %39, %47, %cst_16 {dimension_numbers = #tpu.dot_dimension_numbers<[1], [0], [0], [1], [0, 0, 1, 1], [], []>} : vector<8x32xbf16>, vector<32x128xbf16>, vector<8x128xf32> -> vector<8x128xf32>
    %c3_i32 = arith.constant 3 : i32
    %49 = arith.index_cast %c3_i32 : i32 to index
    %c0_17 = arith.constant 0 : index
    %c0_18 = arith.constant 0 : index
    %50 = vector.load %arg2[%49, %c0_17, %c0_18] : memref<8x4x128xbf16, #tpu.memory_space<vmem>>, vector<1x4x128xbf16>
    %51 = vector.shape_cast %50 : vector<1x4x128xbf16> to vector<4x128xbf16>
    %52 = arith.index_cast %c3_i32 : i32 to index
    %c0_19 = arith.constant 0 : index
    %c0_20 = arith.constant 0 : index
    %53 = vector.load %arg3[%52, %c0_19, %c0_20] : memref<8x8x32xbf16, #tpu.memory_space<vmem>>, vector<1x8x32xbf16>
    %54 = vector.shape_cast %53 : vector<1x8x32xbf16> to vector<8x32xbf16>
    %55 = arith.extf %51 : vector<4x128xbf16> to vector<4x128xf32>
    %56 = vector.shape_cast %55 : vector<4x128xf32> to vector<4x1x128xf32>
    %57 = vector.shape_cast %48 : vector<8x128xf32> to vector<1x8x128xf32>
    %58 = vector.broadcast %56 : vector<4x1x128xf32> to vector<4x8x128xf32>
    %59 = vector.broadcast %57 : vector<1x8x128xf32> to vector<4x8x128xf32>
    %60 = arith.mulf %58, %59 : vector<4x8x128xf32>
    %61 = vector.shape_cast %60 : vector<4x8x128xf32> to vector<32x128xf32>
    %62 = arith.truncf %61 : vector<32x128xf32> to vector<32x128xbf16>
    %cst_21 = arith.constant dense<0.000000e+00> : vector<8x128xf32>
    %63 = tpu.matmul %54, %62, %cst_21 {dimension_numbers = #tpu.dot_dimension_numbers<[1], [0], [0], [1], [0, 0, 1, 1], [], []>} : vector<8x32xbf16>, vector<32x128xbf16>, vector<8x128xf32> -> vector<8x128xf32>
    %c4_i32 = arith.constant 4 : i32
    %64 = arith.index_cast %c4_i32 : i32 to index
    %c0_22 = arith.constant 0 : index
    %c0_23 = arith.constant 0 : index
    %65 = vector.load %arg2[%64, %c0_22, %c0_23] : memref<8x4x128xbf16, #tpu.memory_space<vmem>>, vector<1x4x128xbf16>
    %66 = vector.shape_cast %65 : vector<1x4x128xbf16> to vector<4x128xbf16>
    %67 = arith.index_cast %c4_i32 : i32 to index
    %c0_24 = arith.constant 0 : index
    %c0_25 = arith.constant 0 : index
    %68 = vector.load %arg3[%67, %c0_24, %c0_25] : memref<8x8x32xbf16, #tpu.memory_space<vmem>>, vector<1x8x32xbf16>
    %69 = vector.shape_cast %68 : vector<1x8x32xbf16> to vector<8x32xbf16>
    %70 = arith.extf %66 : vector<4x128xbf16> to vector<4x128xf32>
    %71 = vector.shape_cast %70 : vector<4x128xf32> to vector<4x1x128xf32>
    %72 = vector.shape_cast %63 : vector<8x128xf32> to vector<1x8x128xf32>
    %73 = vector.broadcast %71 : vector<4x1x128xf32> to vector<4x8x128xf32>
    %74 = vector.broadcast %72 : vector<1x8x128xf32> to vector<4x8x128xf32>
    %75 = arith.mulf %73, %74 : vector<4x8x128xf32>
    %76 = vector.shape_cast %75 : vector<4x8x128xf32> to vector<32x128xf32>
    %77 = arith.truncf %76 : vector<32x128xf32> to vector<32x128xbf16>
    %cst_26 = arith.constant dense<0.000000e+00> : vector<8x128xf32>
    %78 = tpu.matmul %69, %77, %cst_26 {dimension_numbers = #tpu.dot_dimension_numbers<[1], [0], [0], [1], [0, 0, 1, 1], [], []>} : vector<8x32xbf16>, vector<32x128xbf16>, vector<8x128xf32> -> vector<8x128xf32>
    %c5_i32 = arith.constant 5 : i32
    %79 = arith.index_cast %c5_i32 : i32 to index
    %c0_27 = arith.constant 0 : index
    %c0_28 = arith.constant 0 : index
    %80 = vector.load %arg2[%79, %c0_27, %c0_28] : memref<8x4x128xbf16, #tpu.memory_space<vmem>>, vector<1x4x128xbf16>
    %81 = vector.shape_cast %80 : vector<1x4x128xbf16> to vector<4x128xbf16>
    %82 = arith.index_cast %c5_i32 : i32 to index
    %c0_29 = arith.constant 0 : index
    %c0_30 = arith.constant 0 : index
    %83 = vector.load %arg3[%82, %c0_29, %c0_30] : memref<8x8x32xbf16, #tpu.memory_space<vmem>>, vector<1x8x32xbf16>
    %84 = vector.shape_cast %83 : vector<1x8x32xbf16> to vector<8x32xbf16>
    %85 = arith.extf %81 : vector<4x128xbf16> to vector<4x128xf32>
    %86 = vector.shape_cast %85 : vector<4x128xf32> to vector<4x1x128xf32>
    %87 = vector.shape_cast %78 : vector<8x128xf32> to vector<1x8x128xf32>
    %88 = vector.broadcast %86 : vector<4x1x128xf32> to vector<4x8x128xf32>
    %89 = vector.broadcast %87 : vector<1x8x128xf32> to vector<4x8x128xf32>
    %90 = arith.mulf %88, %89 : vector<4x8x128xf32>
    %91 = vector.shape_cast %90 : vector<4x8x128xf32> to vector<32x128xf32>
    %92 = arith.truncf %91 : vector<32x128xf32> to vector<32x128xbf16>
    %cst_31 = arith.constant dense<0.000000e+00> : vector<8x128xf32>
    %93 = tpu.matmul %84, %92, %cst_31 {dimension_numbers = #tpu.dot_dimension_numbers<[1], [0], [0], [1], [0, 0, 1, 1], [], []>} : vector<8x32xbf16>, vector<32x128xbf16>, vector<8x128xf32> -> vector<8x128xf32>
    %c6_i32 = arith.constant 6 : i32
    %94 = arith.index_cast %c6_i32 : i32 to index
    %c0_32 = arith.constant 0 : index
    %c0_33 = arith.constant 0 : index
    %95 = vector.load %arg2[%94, %c0_32, %c0_33] : memref<8x4x128xbf16, #tpu.memory_space<vmem>>, vector<1x4x128xbf16>
    %96 = vector.shape_cast %95 : vector<1x4x128xbf16> to vector<4x128xbf16>
    %97 = arith.index_cast %c6_i32 : i32 to index
    %c0_34 = arith.constant 0 : index
    %c0_35 = arith.constant 0 : index
    %98 = vector.load %arg3[%97, %c0_34, %c0_35] : memref<8x8x32xbf16, #tpu.memory_space<vmem>>, vector<1x8x32xbf16>
    %99 = vector.shape_cast %98 : vector<1x8x32xbf16> to vector<8x32xbf16>
    %100 = arith.extf %96 : vector<4x128xbf16> to vector<4x128xf32>
    %101 = vector.shape_cast %100 : vector<4x128xf32> to vector<4x1x128xf32>
    %102 = vector.shape_cast %93 : vector<8x128xf32> to vector<1x8x128xf32>
    %103 = vector.broadcast %101 : vector<4x1x128xf32> to vector<4x8x128xf32>
    %104 = vector.broadcast %102 : vector<1x8x128xf32> to vector<4x8x128xf32>
    %105 = arith.mulf %103, %104 : vector<4x8x128xf32>
    %106 = vector.shape_cast %105 : vector<4x8x128xf32> to vector<32x128xf32>
    %107 = arith.truncf %106 : vector<32x128xf32> to vector<32x128xbf16>
    %cst_36 = arith.constant dense<0.000000e+00> : vector<8x128xf32>
    %108 = tpu.matmul %99, %107, %cst_36 {dimension_numbers = #tpu.dot_dimension_numbers<[1], [0], [0], [1], [0, 0, 1, 1], [], []>} : vector<8x32xbf16>, vector<32x128xbf16>, vector<8x128xf32> -> vector<8x128xf32>
    %c7_i32 = arith.constant 7 : i32
    %109 = arith.index_cast %c7_i32 : i32 to index
    %c0_37 = arith.constant 0 : index
    %c0_38 = arith.constant 0 : index
    %110 = vector.load %arg2[%109, %c0_37, %c0_38] : memref<8x4x128xbf16, #tpu.memory_space<vmem>>, vector<1x4x128xbf16>
    %111 = vector.shape_cast %110 : vector<1x4x128xbf16> to vector<4x128xbf16>
    %112 = arith.index_cast %c7_i32 : i32 to index
    %c0_39 = arith.constant 0 : index
    %c0_40 = arith.constant 0 : index
    %113 = vector.load %arg3[%112, %c0_39, %c0_40] : memref<8x8x32xbf16, #tpu.memory_space<vmem>>, vector<1x8x32xbf16>
    %114 = vector.shape_cast %113 : vector<1x8x32xbf16> to vector<8x32xbf16>
    %115 = arith.extf %111 : vector<4x128xbf16> to vector<4x128xf32>
    %116 = vector.shape_cast %115 : vector<4x128xf32> to vector<4x1x128xf32>
    %117 = vector.shape_cast %108 : vector<8x128xf32> to vector<1x8x128xf32>
    %118 = vector.broadcast %116 : vector<4x1x128xf32> to vector<4x8x128xf32>
    %119 = vector.broadcast %117 : vector<1x8x128xf32> to vector<4x8x128xf32>
    %120 = arith.mulf %118, %119 : vector<4x8x128xf32>
    %121 = vector.shape_cast %120 : vector<4x8x128xf32> to vector<32x128xf32>
    %122 = arith.truncf %121 : vector<32x128xf32> to vector<32x128xbf16>
    %cst_41 = arith.constant dense<0.000000e+00> : vector<8x128xf32>
    %123 = tpu.matmul %114, %122, %cst_41 {dimension_numbers = #tpu.dot_dimension_numbers<[1], [0], [0], [1], [0, 0, 1, 1], [], []>} : vector<8x32xbf16>, vector<32x128xbf16>, vector<8x128xf32> -> vector<8x128xf32>
    %c8_i32 = arith.constant 8 : i32
    %c0_42 = arith.constant 0 : index
    %c0_43 = arith.constant 0 : index
    %124 = vector.load %arg6[%c0_42, %c0_43] : memref<8x128xf32, #tpu.memory_space<vmem>>, vector<8x128xf32>
    tpu.vector_store %arg6[%c0_42, %c0_43], %123 {strides = array<i32>} : memref<8x128xf32, #tpu.memory_space<vmem>>, vector<8x128xf32>,
    %c0_i32_44 = arith.constant 0 : i32
    %125 = arith.cmpi eq, %arg1, %c0_i32_44 : i32
    %126 = arith.extui %125 : i1 to i32
    %c0_i32_45 = arith.constant 0 : i32
    %127 = arith.cmpi ne, %126, %c0_i32_45 : i32
    scf.if %127 {
      %c0_46 = arith.constant 0 : index
      %c0_47 = arith.constant 0 : index
      %128 = vector.load %arg6[%c0_46, %c0_47] : memref<8x128xf32, #tpu.memory_space<vmem>>, vector<8x128xf32>
      %cst_48 = arith.constant 1.000000e+00 : f32
      %129 = vector.broadcast %cst_48 : f32 to vector<8x128xf32>
      %130 = tpu.concatenate %128, %129 in 0 : vector<8x128xf32>, vector<8x128xf32> -> vector<16x128xf32>
      %c0_49 = arith.constant 0 : index
      %c0_50 = arith.constant 0 : index
      %131 = vector.load %arg4[%c0_49, %c0_50] : memref<16x16xf32, #tpu.memory_space<vmem>>, vector<16x16xf32>
      %cst_51 = arith.constant dense<0.000000e+00> : vector<16x128xf32>
      %132 = tpu.matmul %131, %130, %cst_51 {dimension_numbers = #tpu.dot_dimension_numbers<[1], [0], [0], [1], [0, 0, 1, 1], [], []>, precision = #tpu.contract_precision<fp32>} : vector<16x16xf32>, vector<16x128xf32>, vector<16x128xf32> -> vector<16x128xf32>
      %c0_52 = arith.constant 0 : index
      %c0_53 = arith.constant 0 : index
      %133 = vector.load %arg5[%c0_52, %c0_53] : memref<16x128xf32, #tpu.memory_space<vmem>>, vector<16x128xf32>
      tpu.vector_store %arg5[%c0_52, %c0_53], %132 {strides = array<i32>} : memref<16x128xf32, #tpu.memory_space<vmem>>, vector<16x128xf32>,
    } else {
    }
    return
  }
  func.func @transform_0(%arg0: i32, %arg1: i32) -> (i32, i32, i32) {
    %c0_i32 = arith.constant 0 : i32
    %c0_i32_0 = arith.constant 0 : i32
    return %arg1, %c0_i32, %arg0 : i32, i32, i32
  }
  func.func @transform_1(%arg0: i32, %arg1: i32) -> (i32, i32, i32) {
    %c0_i32 = arith.constant 0 : i32
    %c0_i32_0 = arith.constant 0 : i32
    %c0_i32_1 = arith.constant 0 : i32
    return %arg1, %c0_i32, %c0_i32_0 : i32, i32, i32
  }
  func.func @transform_2(%arg0: i32, %arg1: i32) -> (i32, i32) {
    %c0_i32 = arith.constant 0 : i32
    %c0_i32_0 = arith.constant 0 : i32
    %c0_i32_1 = arith.constant 0 : i32
    return %c0_i32, %c0_i32_0 : i32, i32
  }
  func.func @transform_3(%arg0: i32, %arg1: i32) -> (i32, i32) {
    %c0_i32 = arith.constant 0 : i32
    %c0_i32_0 = arith.constant 0 : i32
    return %c0_i32, %arg0 : i32, i32
  }
}

</mosaic_0001>

<bundles_post_ra>
// kernel: _lambda_.1
= control target key start
LH: loop header
LB: loop body
LE: loop exit
PB: predicated region body
PF: predicated region fallthrough
CT: control target
= control target key end

     0   :  { %v19_v0 = vlaneseq  ;;  %vm35_vm0 = vcmask 1042434   ;;  %vm38_vm1 = vcmask 1043459   ;;  %vm30_vm2 = vcmask 1040384   ;;  %s726_s0 = inlined_call_operand.vmem [shape: bf16[8,4,128], index: 0, kind: input, shape index: {}]   ;;  %s727_s1 = inlined_call_operand.vmem [shape: bf16[8,8,32], index: 1, kind: input, shape index: {}]   ;;  %s728_s2 = inlined_call_operand.vmem [shape: f32[16,16], index: 2, kind: input, shape index: {}]   ;;  %s729_s3 = inlined_call_operand.vmem [shape: f32[16,128], index: 3, kind: output, shape index: {}]  }
   0x1   :  { %v25_v1 = vld [vmem:[%s726_s0] sm:$0x3]  ;;  %vm32_vm3 = vcmask 1041409   ;;  %v604_v13 = vmov 0.0   ;;  %vm55_vm5 = vcmask 261120   ;;  %vm387_vm6 = vcmask 130048  }
   0x2   :  { %v20_v2 = vshrl.u32 %v19_v0, 7  ;;  %v27_v3 = vunpack.c.l.bf16 %v25_v1  ;;  %v26_v24 = vld [vmem:[%s727_s1] sm:$0xf]  ;;  %v579_v47 = vld [vmem:[%s727_s1 + $0x4] sm:$0xf] }
   0x3   :  { %v578_v25 = vld [vmem:[%s726_s0 + $0x2] sm:$0x3]  ;;  %v581_v48 = vld [vmem:[%s726_s0 + $0x4] sm:$0x3] }
   0x4   :  { %v29_v4 = vrot.slane %v27_v3, 3  ;;  %vm21_vm4 = vcmp.eq.s32.totalorder %v20_v2, 0  ;;  %v76_v26 = vunpack.c.l.bf16 %v578_v25  ;;  %v120_v49 = vunpack.c.l.bf16 %v581_v48 }
   0x5   :  { %v22_v14 = vsel %vm21_vm4, 1.0, %v604_v13 }
   0x6   :  { %v36_v5 = vsel %vm35_vm0, %v27_v3, %v29_v4  ;;  %v39_v6 = vsel %vm38_vm1, %v27_v3, %v29_v4  ;;  %v31_v7 = vsel %vm30_vm2, %v27_v3, %v29_v4  ;;  %v33_v8 = vsel %vm32_vm3, %v27_v3, %v29_v4 }
   0x7   :  { %v37_v9 = vrot.slane %v36_v5, 2  ;;  %v40_v10 = vrot.slane %v39_v6, 3  ;;  %v34_v11 = vrot.slane %v33_v8, 1  ;;  %v41_v12 = vperm.slane %v31_v7, 0  ;;  %v582_v6 = vld [vmem:[%s727_s1 + $0x8] sm:$0xf] }
   0x8   :  { %v78_v27 = vrot.slane %v76_v26, 3  ;;  %v122_v50 = vrot.slane %v120_v49, 3  ;;  %v584_v7 = vld [vmem:[%s726_s0 + $0x6] sm:$0x3] }
   0x9   :  { %v43_v15 = vperm.slane %v37_v9, 0  ;;  %v44_v16 = vperm.slane %v40_v10, 0  ;;  %v42_v17 = vperm.slane %v34_v11, 0  ;;  %v49_v20 = vmul.f32 %v41_v12, %v22_v14 }
   0xa   :  { %v82_v28 = vsel %vm35_vm0, %v76_v26, %v78_v27  ;;  %v84_v29 = vsel %vm38_vm1, %v76_v26, %v78_v27  ;;  %v80_v30 = vsel %vm32_vm3, %v76_v26, %v78_v27  ;;  %v79_v34 = vsel %vm30_vm2, %v76_v26, %v78_v27 }
   0xb   :  { %v51_v18 = vmul.f32 %v43_v15, %v22_v14  ;;  %v52_v19 = vmul.f32 %v44_v16, %v22_v14  ;;  %v50_v21 = vmul.f32 %v42_v17, %v22_v14  ;;  %v83_v31 = vrot.slane %v82_v28, 2 }
   0xc   :  { %v85_v32 = vrot.slane %v84_v29, 3  ;;  %v81_v33 = vrot.slane %v80_v30, 1  ;;  %v86_v37 = vperm.slane %v79_v34, 0  ;;  %v126_v51 = vsel %vm35_vm0, %v120_v49, %v122_v50  ;;  %v585_v29 = vld [vmem:[%s727_s1 + $0xc] sm:$0xf] }
   0xd   :  { %v54_v22 = vpack.c.bf16 %v52_v19, %v51_v18  ;;  %v53_v23 = vpack.c.bf16 %v50_v21, %v49_v20  ;;  %v88_v35 = vperm.slane %v83_v31, 0  ;;  %v128_v52 = vsel %vm38_vm1, %v120_v49, %v122_v50  ;;  %v587_v30 = vld [vmem:[%s726_s0 + $0x8] sm:$0x3] }
   0xe   :  { %v89_v36 = vperm.slane %v85_v32, 0  ;;  %v87_v38 = vperm.slane %v81_v33, 0  ;;  %v124_v53 = vsel %vm32_vm3, %v120_v49, %v122_v50  ;;  %v127_v54 = vrot.slane %v126_v51, 2 }
   0xf   :  { %65 = vmatpush.bf16.msra.mxu0 %v54_v22  ;;  %v129_v55 = vrot.slane %v128_v52, 3  ;;  %v125_v56 = vrot.slane %v124_v53, 1  ;;  %v123_v57 = vsel %vm30_vm2, %v120_v49, %v122_v50  ;;  %v164_v8 = vunpack.c.l.bf16 %v584_v7  ;;  %v588_v52 = vld [vmem:[%s727_s1 + $0x10] sm:$0xf]  ;;  %v590_v53 = vld [vmem:[%s726_s0 + $0xa] sm:$0x3] }
  0x10   :  { %v132_v58 = vperm.slane %v127_v54, 0  ;;  %v130_v60 = vperm.slane %v123_v57, 0  ;;  %v208_v31 = vunpack.c.l.bf16 %v587_v30  ;;  %v252_v54 = vunpack.c.l.bf16 %v590_v53 }
  0x11   :  { %v133_v59 = vperm.slane %v129_v55, 0  ;;  %v131_v61 = vperm.slane %v125_v56, 0  ;;  %v166_v9 = vrot.slane %v164_v8, 3 }
  0x12   :  { %v210_v32 = vrot.slane %v208_v31, 3  ;;  %v254_v55 = vrot.slane %v252_v54, 3 }
  0x13   :  { %66 = vmatpush.bf16.msra.mxu0 %v53_v23  ;;  %v170_v10 = vsel %vm35_vm0, %v164_v8, %v166_v9  ;;  %v172_v11 = vsel %vm38_vm1, %v164_v8, %v166_v9  ;;  %v168_v12 = vsel %vm32_vm3, %v164_v8, %v166_v9  ;;  %v167_v16 = vsel %vm30_vm2, %v164_v8, %v166_v9 }
  0x14   :  { %v171_v13 = vrot.slane %v170_v10, 2  ;;  %v173_v14 = vrot.slane %v172_v11, 3  ;;  %v169_v15 = vrot.slane %v168_v12, 1  ;;  %v174_v19 = vperm.slane %v167_v16, 0  ;;  %v591_v11 = vld [vmem:[%s727_s1 + $0x14] sm:$0xf] }
  0x15   :  { %v214_v33 = vsel %vm35_vm0, %v208_v31, %v210_v32  ;;  %v216_v34 = vsel %vm38_vm1, %v208_v31, %v210_v32  ;;  %v258_v56 = vsel %vm35_vm0, %v252_v54, %v254_v55  ;;  %v260_v57 = vsel %vm38_vm1, %v252_v54, %v254_v55  ;;  %v593_v12 = vld [vmem:[%s726_s0 + $0xc] sm:$0x3] }
  0x16   :  { %577 = vmatmul.msk.bf16.vlgmr.msra.gmra.mxu0 %vm55_vm5, %v26_v24  ;;  %v176_v17 = vperm.slane %v171_v13, 0  ;;  %v177_v18 = vperm.slane %v173_v14, 0  ;;  %v175_v20 = vperm.slane %v169_v15, 0  ;;  %v296_v13 = vunpack.c.l.bf16 %v593_v12 }
  0x18   :  { %v298_v14 = vrot.slane %v296_v13, 3 }
  0x1a   :  { %v302_v15 = vsel %vm35_vm0, %v296_v13, %v298_v14  ;;  %v304_v16 = vsel %vm38_vm1, %v296_v13, %v298_v14 }
  0x93   :  { %v68_v39 = vpop.f32.mrf.mxu0 }
  0x94   :  { %v96_v40 = vmul.f32 %v88_v35, %v68_v39  ;;  %v97_v41 = vmul.f32 %v89_v36, %v68_v39  ;;  %v94_v43 = vmul.f32 %v86_v37, %v68_v39  ;;  %v95_v44 = vmul.f32 %v87_v38, %v68_v39 }
  0x95   :  { %v212_v35 = vsel %vm32_vm3, %v208_v31, %v210_v32  ;;  %v215_v36 = vrot.slane %v214_v33, 2  ;;  %v217_v37 = vrot.slane %v216_v34, 3  ;;  %v211_v39 = vsel %vm30_vm2, %v208_v31, %v210_v32  ;;  %v594_v34 = vld [vmem:[%s727_s1 + $0x18] sm:$0xf] }
  0x96   :  { %v99_v42 = vpack.c.bf16 %v97_v41, %v96_v40  ;;  %v98_v45 = vpack.c.bf16 %v95_v44, %v94_v43  ;;  %v213_v38 = vrot.slane %v212_v35, 1  ;;  %v596_v35 = vld [vmem:[%s726_s0 + $0xe] sm:$0x3] }
  0x97   :  { %v220_v40 = vperm.slane %v215_v36, 0  ;;  %v221_v41 = vperm.slane %v217_v37, 0  ;;  %v340_v36 = vunpack.c.l.bf16 %v596_v35 }
  0x98   :  { %109 = vmatpush.bf16.msra.mxu1 %v99_v42  ;;  %v218_v42 = vperm.slane %v211_v39, 0  ;;  %v219_v43 = vperm.slane %v213_v38, 0 }
  0x99   :  { %v342_v37 = vrot.slane %v340_v36, 3 }
  0x9b   :  { %v70_v46 = vpop.f32.mrf.mxu0  ;;  %v346_v38 = vsel %vm35_vm0, %v340_v36, %v342_v37  ;;  %v348_v39 = vsel %vm38_vm1, %v340_v36, %v342_v37 }
  0x9c   :  { %110 = vmatpush.bf16.msra.mxu1 %v98_v45 }
  0x9f   :  { %580 = vmatmul.msk.bf16.vlgmr.msra.gmra.mxu1 %vm55_vm5, %v579_v47 }
 0x11c   :  { %v112_v62 = vpop.f32.mrf.mxu1 }
 0x11d   :  { %v140_v63 = vmul.f32 %v132_v58, %v112_v62  ;;  %v141_v0 = vmul.f32 %v133_v59, %v112_v62  ;;  %v138_v2 = vmul.f32 %v130_v60, %v112_v62  ;;  %v139_v3 = vmul.f32 %v131_v61, %v112_v62 }
 0x11e   :  { %v256_v58 = vsel %vm32_vm3, %v252_v54, %v254_v55  ;;  %v259_v59 = vrot.slane %v258_v56, 2  ;;  %v261_v60 = vrot.slane %v260_v57, 3  ;;  %v255_v62 = vsel %vm30_vm2, %v252_v54, %v254_v55  ;;  %v597_v57 = vld [vmem:[%s727_s1 + $0x1c] sm:$0xf] }
 0x11f   :  { %v143_v1 = vpack.c.bf16 %v141_v0, %v140_v63  ;;  %v142_v4 = vpack.c.bf16 %v139_v3, %v138_v2  ;;  %v257_v61 = vrot.slane %v256_v58, 1  ;;  %v605_v58 = vmov 1.0  }
 0x120   :  { %v264_v63 = vperm.slane %v259_v59, 0  ;;  %v265_v0 = vperm.slane %v261_v60, 0  ;;  %v386_v59 = vld [vmem:[%s728_s2 + $0x8] sm:$0xff]  ;;  %v385_v60 = vld [vmem:[%s728_s2] sm:$0xff] }
 0x121   :  { %153 = vmatpush.bf16.msra.mxu2 %v143_v1  ;;  %v262_v1 = vperm.slane %v255_v62, 0  ;;  %v263_v2 = vperm.slane %v257_v61, 0  ;;  %v392_v61 = vsel %vm387_vm6, %v386_v59, 0  ;;  %v389_v62 = vsel %vm387_vm6, %v385_v60, 0 }
 0x124   :  { %v114_v5 = vpop.f32.mrf.mxu1 }
 0x125   :  { %154 = vmatpush.bf16.msra.mxu2 %v142_v4 }
 0x128   :  { %583 = vmatmul.msk.bf16.vlgmr.msra.gmra.mxu2 %vm55_vm5, %v582_v6 }
 0x1ab   :  { %v156_v21 = vpop.f32.mrf.mxu2 }
 0x1ac   :  { %v184_v22 = vmul.f32 %v176_v17, %v156_v21  ;;  %v185_v23 = vmul.f32 %v177_v18, %v156_v21  ;;  %v182_v25 = vmul.f32 %v174_v19, %v156_v21  ;;  %v183_v26 = vmul.f32 %v175_v20, %v156_v21 }
 0x1ad   :  { %v300_v17 = vsel %vm32_vm3, %v296_v13, %v298_v14  ;;  %v303_v18 = vrot.slane %v302_v15, 2  ;;  %v305_v19 = vrot.slane %v304_v16, 3  ;;  %v299_v21 = vsel %vm30_vm2, %v296_v13, %v298_v14 }
 0x1ae   :  { %v187_v24 = vpack.c.bf16 %v185_v23, %v184_v22  ;;  %v186_v27 = vpack.c.bf16 %v183_v26, %v182_v25  ;;  %v301_v20 = vrot.slane %v300_v17, 1 }
 0x1af   :  { %v308_v22 = vperm.slane %v303_v18, 0  ;;  %v309_v23 = vperm.slane %v305_v19, 0 }
 0x1b0   :  { %197 = vmatpush.bf16.msra.mxu3 %v187_v24  ;;  %v306_v24 = vperm.slane %v299_v21, 0  ;;  %v307_v25 = vperm.slane %v301_v20, 0 }
 0x1b3   :  { %v158_v28 = vpop.f32.mrf.mxu2 }
 0x1b4   :  { %198 = vmatpush.bf16.msra.mxu3 %v186_v27 }
 0x1b7   :  { %586 = vmatmul.msk.bf16.vlgmr.msra.gmra.mxu3 %vm55_vm5, %v585_v29 }
 0x23a   :  { %v200_v44 = vpop.f32.mrf.mxu3 }
 0x23b   :  { %v228_v45 = vmul.f32 %v220_v40, %v200_v44  ;;  %v229_v46 = vmul.f32 %v221_v41, %v200_v44  ;;  %v226_v48 = vmul.f32 %v218_v42, %v200_v44  ;;  %v227_v49 = vmul.f32 %v219_v43, %v200_v44 }
 0x23c   :  { %v344_v40 = vsel %vm32_vm3, %v340_v36, %v342_v37  ;;  %v347_v41 = vrot.slane %v346_v38, 2  ;;  %v349_v42 = vrot.slane %v348_v39, 3  ;;  %v343_v44 = vsel %vm30_vm2, %v340_v36, %v342_v37 }
 0x23d   :  { %v231_v47 = vpack.c.bf16 %v229_v46, %v228_v45  ;;  %v230_v50 = vpack.c.bf16 %v227_v49, %v226_v48  ;;  %v345_v43 = vrot.slane %v344_v40, 1 }
 0x23e   :  { %v352_v45 = vperm.slane %v347_v41, 0  ;;  %v353_v46 = vperm.slane %v349_v42, 0 }
 0x23f   :  { %241 = vmatpush.bf16.msrb.mxu0 %v231_v47  ;;  %v350_v47 = vperm.slane %v343_v44, 0  ;;  %v351_v48 = vperm.slane %v345_v43, 0 }
 0x242   :  { %v202_v51 = vpop.f32.mrf.mxu3 }
 0x243   :  { %242 = vmatpush.bf16.msrb.mxu0 %v230_v50 }
 0x246   :  { %589 = vmatmul.msk.bf16.vlgmr.msrb.gmra.mxu0 %vm55_vm5, %v588_v52 }
 0x247   :  { %408 = vmatpush.msra.mxu0 %v605_v58 }
 0x2c3   :  { %v244_v3 = vpop.f32.mrf.mxu0 }
 0x2c4   :  { %v272_v4 = vmul.f32 %v264_v63, %v244_v3  ;;  %v273_v5 = vmul.f32 %v265_v0, %v244_v3  ;;  %v270_v7 = vmul.f32 %v262_v1, %v244_v3  ;;  %v271_v8 = vmul.f32 %v263_v2, %v244_v3 }
 0x2c5   :  { %v419_v63 = vand.u32 4294901760, %v392_v61  ;;  %v411_v0 = vand.u32 4294901760, %v389_v62 }
 0x2c6   :  { %v275_v6 = vpack.c.bf16 %v273_v5, %v272_v4  ;;  %v274_v9 = vpack.c.bf16 %v271_v8, %v270_v7 }
 0x2c7   :  { %v420_v1 = vsub.f32 %v392_v61, %v419_v63  ;;  %v412_v2 = vsub.f32 %v389_v62, %v411_v0 }
 0x2c8   :  { %285 = vmatpush.bf16.msrb.mxu1 %v275_v6 }
 0x2c9   :  { %v421_v3 = vand.u32 4294901760, %v420_v1  ;;  %v413_v4 = vand.u32 4294901760, %v412_v2 }
 0x2cb   :  { %v246_v10 = vpop.f32.mrf.mxu0  ;;  %v422_v5 = vsub.f32 %v420_v1, %v421_v3  ;;  %v414_v6 = vsub.f32 %v412_v2, %v413_v4 }
 0x2cc   :  { %286 = vmatpush.bf16.msrb.mxu1 %v274_v9 }
 0x2cd   :  { %v423_v8 = vand.u32 4294901760, %v422_v5  ;;  %v415_v9 = vand.u32 4294901760, %v414_v6 }
 0x2cf   :  { %592 = vmatmul.msk.bf16.vlgmr.msrb.gmra.mxu1 %vm55_vm5, %v591_v11 }
 0x34c   :  { %v288_v26 = vpop.f32.mrf.mxu1 }
 0x34d   :  { %v316_v27 = vmul.f32 %v308_v22, %v288_v26  ;;  %v317_v28 = vmul.f32 %v309_v23, %v288_v26  ;;  %v314_v30 = vmul.f32 %v306_v24, %v288_v26  ;;  %v315_v31 = vmul.f32 %v307_v25, %v288_v26 }
 0x34f   :  { %v319_v29 = vpack.c.bf16 %v317_v28, %v316_v27  ;;  %v318_v32 = vpack.c.bf16 %v315_v31, %v314_v30 }
 0x351   :  { %329 = vmatpush.bf16.msrb.mxu2 %v319_v29 }
 0x354   :  { %v290_v33 = vpop.f32.mrf.mxu1 }
 0x355   :  { %330 = vmatpush.bf16.msrb.mxu2 %v318_v32 }
 0x358   :  { %595 = vmatmul.msk.bf16.vlgmr.msrb.gmra.mxu2 %vm55_vm5, %v594_v34 }
 0x359   :  { %599 = vmatpush.msra.mxu2 %v605_v58 }
 0x3db   :  { %v332_v49 = vpop.f32.mrf.mxu2 }
 0x3dc   :  { %v360_v50 = vmul.f32 %v352_v45, %v332_v49  ;;  %v361_v51 = vmul.f32 %v353_v46, %v332_v49  ;;  %v358_v53 = vmul.f32 %v350_v47, %v332_v49  ;;  %v359_v54 = vmul.f32 %v351_v48, %v332_v49 }
 0x3de   :  { %v363_v52 = vpack.c.bf16 %v361_v51, %v360_v50  ;;  %v362_v55 = vpack.c.bf16 %v359_v54, %v358_v53 }
 0x3e0   :  { %373 = vmatpush.bf16.msrb.mxu3 %v363_v52 }
 0x3e3   :  { %v334_v56 = vpop.f32.mrf.mxu2 }
 0x3e4   :  { %374 = vmatpush.bf16.msrb.mxu3 %v362_v55 }
 0x3e7   :  { %598 = vmatmul.msk.bf16.vlgmr.msrb.gmra.mxu3 %vm55_vm5, %v597_v57 }
 0x46a   :  { %v376_v7 = vpop.f32.mrf.mxu3 }
 0x46b   :  { %v409_v10 = vand.u32 4294901760, %v376_v7 }
 0x46d   :  { %v444_v11 = vsub.f32 %v376_v7, %v409_v10  ;;  %410 = vmatpush.msra.mxu0 %v409_v10  ;;  %600 = vmatpush.msra.mxu2 %v409_v10 }
 0x46e   :  { %424 = vmatmul.f32.vlgmr.msra.gmra.mxu2 %v423_v8  ;;  %416 = vmatmul.f32.vlgmr.msra.gmra.mxu0 %v415_v9 }
 0x46f   :  { %v445_v12 = vand.u32 4294901760, %v444_v11  ;;  %475 = vmatpush.msrb.mxu2 %v444_v11 }
 0x471   :  { %v446_v13 = vsub.f32 %v444_v11, %v445_v12  ;;  %535 = vmatpush.msrb.mxu0 %v445_v12 }
 0x472   :  { %v378_v14 = vpop.f32.mrf.mxu3 }
 0x473   :  { %v447_v15 = vand.u32 4294901760, %v446_v13 }
 0x475   :  { %448 = vmatpush.msra.mxu1 %v447_v15  ;;  %601 = vmatpush.msra.mxu3 %v447_v15 }
 0x476   :  { %454 = vmatmul.f32.vlgmr.msra.gmra.mxu3 %v419_v63  ;;  %478 = vmatmul.f32.vlgmr.msrb.gmra.mxu2 %v412_v2 }
 0x477   :  { %501 = vmatpush.msrb.mxu3 %v605_v58  ;;  %559 = vmatpush.msrb.mxu1 %v605_v58 }
 0x478   :  { %450 = vmatmul.f32.vlgmr.msra.gmra.mxu1 %v411_v0  ;;  %537 = vmatmul.f32.vlgmr.msrb.gmra.mxu0 %v411_v0 }
 0x479   :  { %503 = vmatpush.msrb.mxu3 %v409_v10  ;;  %561 = vmatpush.msrb.mxu1 %v409_v10 }
 0x47e   :  { %507 = vmatmul.f32.vlgmr.msrb.gmra.mxu3 %v413_v4  ;;  %483 = vmatmul.f32.gmra.mxu2 %v420_v1 }
 0x480   :  { %563 = vmatmul.f32.vlgmr.msrb.gmra.mxu1 %v411_v0  ;;  %541 = vmatmul.f32.gmra.mxu0 %v419_v63 }
 0x486   :  { %513 = vmatmul.f32.gmra.mxu3 %v421_v3 }
 0x488   :  { %567 = vmatmul.f32.gmra.mxu1 %v419_v63 }
 0x4eb   :  { %v417_v17 = vpop.f32.mrf.mxu0 }
 0x4f1   :  { %v425_v16 = vpop.f32.mrf.mxu2 }
 0x4f5   :  { %v451_v19 = vpop.f32.mrf.mxu1  ;;  %v538_v22 = vpop.f32.mrf.mxu0 }
 0x4f6   :  { %v452_v21 = vadd.f32 %v451_v19, %v417_v17 }
 0x4f9   :  { %v455_v18 = vpop.f32.mrf.mxu3  ;;  %v479_v20 = vpop.f32.mrf.mxu2 }
 0x4fa   :  { %v480_v23 = vadd.f32 %v479_v20, %v452_v21  ;;  %v456_v29 = vadd.f32 %v455_v18, %v425_v16 }
 0x4fd   :  { %v564_v25 = vpop.f32.mrf.mxu1  ;;  %v542_v33 = vpop.f32.mrf.mxu0 }
 0x501   :  { %v508_v24 = vpop.f32.mrf.mxu3  ;;  %v484_v28 = vpop.f32.mrf.mxu2 }
 0x502   :  { %v509_v26 = vadd.f32 %v508_v24, %v480_v23  ;;  %v485_v31 = vadd.f32 %v484_v28, %v456_v29 }
 0x504   :  { %v539_v27 = vadd.f32 %v538_v22, %v509_v26 }
 0x505   :  { %v568_v35 = vpop.f32.mrf.mxu1 }
 0x506   :  { %v565_v30 = vadd.f32 %v564_v25, %v539_v27 }
 0x508   :  { %571 = vst [vmem:[%s729_s3] sm:$0xff] %v565_v30 }
 0x509   :  { %v514_v32 = vpop.f32.mrf.mxu3 }
 0x50a   :  { %v515_v34 = vadd.f32 %v514_v32, %v485_v31 }
 0x50c   :  { %v543_v36 = vadd.f32 %v542_v33, %v515_v34 }
 0x50e   :  { %v569_v37 = vadd.f32 %v568_v35, %v543_v36 }
 0x510   :  { %572 = vst [vmem:[%s729_s3 + $0x8] sm:$0xff] %v569_v37 }

</bundles_post_ra>
